<compile_context>
chip_gen: v7x
topology: tpu7x:2x2x1
jax: 0.10.0
libtpu: 0.0.40
codegen_flags: <defaults>
</compile_context>

<pallas_src>
import jax
import jax.numpy as jnp
from jax import lax
from jax.experimental import pallas as pl
from jax.experimental.pallas import tpu as pltpu


def _stock2_lstm_kernel(x_ref, wih_ref, whh_ref, bias_ref, wl_ref, bl_ref,
                        out_ref):
    # x_ref   : (B, T, I)   raw batch-first input
    # wih_ref : (I, 4H)     input weights, gate order [i, f, o, g]
    # whh_ref : (H, 4H)     recurrent weights, gate order [i, f, o, g]
    # bias_ref: (1, 4H)     b_ih + b_hh, gate order [i, f, o, g]
    # wl_ref  : (H, 6)      fused head weights
    # bl_ref  : (1, 6)      fused head biases
    # out_ref : (B, 6)
    B, T, I = x_ref.shape
    H = whh_ref.shape[0]
    G = 4 * H

    # ---- Prologue (runs once): fused time-parallel input projection ----
    x_flat = x_ref[...].reshape(B * T, I)                         # (B*T, I)
    proj = jnp.dot(x_flat, wih_ref[...],
                   preferred_element_type=jnp.float32)            # (B*T, 4H)
    proj = (proj + bias_ref[...]).reshape(B, T, G)                 # batch-major

    # ---- Loop-invariant operands, hoisted out of the recurrence ----
    whh_bf = whh_ref[...].astype(jnp.bfloat16)                     # bf16 MXU path

    # Per-lane constants for the single-tanh gate activation:
    #   sigmoid(z) = 0.5 + 0.5*tanh(0.5*z)  on lanes [0, 3H)   (i | f | o)
    #   tanh(z)                             on lanes [3H, 4H)  (g)
    lane = lax.broadcasted_iota(jnp.int32, (B, G), 1)
    is_sig = lane < 3 * H
    pre = jnp.where(is_sig, 0.5, 1.0).astype(jnp.float32)          # also post-mul
    post_add = jnp.where(is_sig, 0.5, 0.0).astype(jnp.float32)

    h = jnp.zeros((B, H), jnp.float32)
    c = jnp.zeros((B, H), jnp.float32)

    # Fully unrolled static recurrence (T is small -> max LLO visibility,
    # purely static slicing, no per-step loop/grid overhead).
    # TODO(synk): for large T, switch to lax.fori_loop with a capped unroll
    # and a VMEM scratch holding `proj`, to bound code size / vreg pressure.
    for t in range(T):
        gates = proj[:, t, :] + jnp.dot(h.astype(jnp.bfloat16), whh_bf,
                                        preferred_element_type=jnp.float32)
        # One full-width tanh over [i | f | o | g]; per-lane affine recovers
        # sigmoid on the first 3H lanes and plain tanh on the last H lanes.
        act = jnp.tanh(gates * pre) * pre + post_add
        i_g = act[:, 0 * H:1 * H]
        f_g = act[:, 1 * H:2 * H]
        o_g = act[:, 2 * H:3 * H]
        g_g = act[:, 3 * H:4 * H]
        c = f_g * c + i_g * g_g
        h = o_g * jnp.tanh(c)

    # Fused 6 Linear(H -> 1) heads: single (B, H) @ (H, 6) matmul + bias.
    out_ref[...] = (jnp.dot(h, wl_ref[...],
                            preferred_element_type=jnp.float32)
                    + bl_ref[...])


@jax.jit
def stock2_forward_fused(x, w_ih_r, w_hh_r, bias_r, w_lin, b_lin):
    """x: (B, T, I) float32 batch-first. Weights already gate-reordered to
    [i, f, o, g] and transposed vs. PyTorch. Returns fused (B, 6) heads."""
    B = x.shape[0]
    vmem = pltpu.MemorySpace.VMEM
    return pl.pallas_call(
        _stock2_lstm_kernel,
        out_shape=jax.ShapeDtypeStruct((B, 6), jnp.float32),
        in_specs=[pl.BlockSpec(memory_space=vmem) for _ in range(6)],
        out_specs=pl.BlockSpec(memory_space=vmem),
    )(x, w_ih_r, w_hh_r, bias_r, w_lin, b_lin)


def stock2_forward(x, w_ih_r, w_hh_r, bias_r, w_lin, b_lin):
    """Module-equivalent API: returns a list of six (B, 1) head outputs.
    The split into six arrays happens outside jit (see perf review)."""
    out = stock2_forward_fused(x, w_ih_r, w_hh_r, bias_r, w_lin, b_lin)
    return [out[:, k:k + 1] for k in range(6)]


def prepare_params(w_ih, w_hh, b_ih, b_hh, w_heads, b_heads, hidden_size):
    """One-time parameter prep (run OUTSIDE jit, once per model):
      * reorder gate columns [i, f, g, o] -> [i, f, o, g] (slice + concat),
      * fold b_ih + b_hh into a single (1, 4H) bias,
      * fuse the six Linear(H, 1) heads into (H, 6) / (1, 6)."""
    H = hidden_size

    def reorder(m):  # columns [i, f, g, o] -> [i, f, o, g]
        return jnp.concatenate([m[:, :2 * H], m[:, 3 * H:], m[:, 2 * H:3 * H]],
                               axis=1)

    bias = (b_ih + b_hh).reshape(1, 4 * H)
    w_lin = jnp.concatenate(w_heads, axis=1)                 # (H, 6)
    b_lin = jnp.concatenate(b_heads).reshape(1, 6)           # (1, 6)
    return reorder(w_ih), reorder(w_hh), reorder(bias), w_lin, b_lin


def _reference_forward(x, w_ih, w_hh, b_ih, b_hh, w_heads, b_heads, H):
    """Pure-JAX f32 reference (lax.scan LSTM, PyTorch gate order [i,f,g,o])."""
    B = x.shape[0]

    def step(carry, x_t):
        h, c = carry
        gates = x_t @ w_ih + h @ w_hh + b_ih + b_hh
        i_g = jax.nn.sigmoid(gates[:, 0 * H:1 * H])
        f_g = jax.nn.sigmoid(gates[:, 1 * H:2 * H])
        g_g = jnp.tanh(gates[:, 2 * H:3 * H])
        o_g = jax.nn.sigmoid(gates[:, 3 * H:4 * H])
        c_new = f_g * c + i_g * g_g
        h_new = o_g * jnp.tanh(c_new)
        return (h_new, c_new), None

    h0 = jnp.zeros((B, H), jnp.float32)
    c0 = jnp.zeros((B, H), jnp.float32)
    (h_last, _), _ = lax.scan(step, (h0, c0), jnp.transpose(x, (1, 0, 2)))
    return [h_last @ w + b for (w, b) in zip(w_heads, b_heads)]


if __name__ == "__main__":
    # Shapes consistent with the module defaults:
    #   input_size=8, hidden_size=32, num_layers=1, output_size=1
    B, T, I, H = 2, 8, 8, 32

    key = jax.random.PRNGKey(0)
    ks = jax.random.split(key, 17)
    scale = 1.0 / float(H) ** 0.5   # PyTorch-style U(-1/sqrt(H), 1/sqrt(H))

    # LSTM params (transposed vs. PyTorch, PyTorch gate order [i, f, g, o]).
    w_ih = jax.random.uniform(ks[0], (I, 4 * H), jnp.float32, -scale, scale)
    w_hh = jax.random.uniform(ks[1], (H, 4 * H), jnp.float32, -scale, scale)
    b_ih = jax.random.uniform(ks[2], (4 * H,), jnp.float32, -scale, scale)
    b_hh = jax.random.uniform(ks[3], (4 * H,), jnp.float32, -scale, scale)

    # Six independent Linear(H -> 1) heads (as in the PyTorch module).
    w_heads = [jax.random.uniform(ks[4 + k], (H, 1), jnp.float32, -scale, scale)
               for k in range(6)]
    b_heads = [jax.random.uniform(ks[10 + k], (1,), jnp.float32, -scale, scale)
               for k in range(6)]

    x = jax.random.normal(ks[16], (B, T, I), jnp.float32)

    # One-time parameter preparation (outside jit).
    w_ih_r, w_hh_r, bias_r, w_lin, b_lin = prepare_params(
        w_ih, w_hh, b_ih, b_hh, w_heads, b_heads, H)

    outs = stock2_forward(x, w_ih_r, w_hh_r, bias_r, w_lin, b_lin)
    outs = jax.block_until_ready(outs)

    refs = _reference_forward(x, w_ih, w_hh, b_ih, b_hh, w_heads, b_heads, H)
    # bf16 recurrent-matmul operands + single-tanh sigmoid -> small drift vs.
    # the exact-f32 reference; tolerance loosened per review (expected ~1e-3).
    for o, r in zip(outs, refs):
        assert o.shape == (B, 1)
        assert jnp.allclose(o, r, atol=2e-2, rtol=2e-2), (
            f"max abs err {jnp.max(jnp.abs(o - r))}")

    print("KERNEL_OK")
</pallas_src>

<mosaic_0001>
module attributes {stable_mosaic.version = 11 : i64} {
  func.func @_stock2_lstm_kernel(%arg0: memref<2x8x8xf32, #tpu.memory_space<vmem>>, %arg1: memref<8x128xf32, #tpu.memory_space<vmem>>, %arg2: memref<32x128xf32, #tpu.memory_space<vmem>>, %arg3: memref<1x128xf32, #tpu.memory_space<vmem>>, %arg4: memref<32x6xf32, #tpu.memory_space<vmem>>, %arg5: memref<1x6xf32, #tpu.memory_space<vmem>>, %arg6: memref<2x6xf32, #tpu.memory_space<vmem>>) attributes {dimension_semantics = [], scalar_prefetch = 0 : i64, scratch_operands = 0 : i64, tpu.core_type = #tpu.core_type<tc>} {
    %c0 = arith.constant 0 : index
    %c0_0 = arith.constant 0 : index
    %c0_1 = arith.constant 0 : index
    %0 = vector.load %arg0[%c0, %c0_0, %c0_1] : memref<2x8x8xf32, #tpu.memory_space<vmem>>, vector<2x8x8xf32>
    %1 = vector.shape_cast %0 : vector<2x8x8xf32> to vector<16x8xf32>
    %c0_2 = arith.constant 0 : index
    %c0_3 = arith.constant 0 : index
    %2 = vector.load %arg1[%c0_2, %c0_3] : memref<8x128xf32, #tpu.memory_space<vmem>>, vector<8x128xf32>
    %cst = arith.constant dense<0.000000e+00> : vector<16x128xf32>
    %3 = tpu.matmul %1, %2, %cst {dimension_numbers = #tpu.dot_dimension_numbers<[1], [0], [0], [1], [0, 0, 1, 1], [], []>} : vector<16x8xf32>, vector<8x128xf32>, vector<16x128xf32> -> vector<16x128xf32>
    %c0_4 = arith.constant 0 : index
    %c0_5 = arith.constant 0 : index
    %4 = vector.load %arg3[%c0_4, %c0_5] : memref<1x128xf32, #tpu.memory_space<vmem>>, vector<1x128xf32>
    %5 = vector.broadcast %4 : vector<1x128xf32> to vector<16x128xf32>
    %6 = arith.addf %3, %5 : vector<16x128xf32>
    %7 = vector.shape_cast %6 : vector<16x128xf32> to vector<2x8x128xf32>
    %c0_6 = arith.constant 0 : index
    %c0_7 = arith.constant 0 : index
    %8 = vector.load %arg2[%c0_6, %c0_7] : memref<32x128xf32, #tpu.memory_space<vmem>>, vector<32x128xf32>
    %9 = arith.truncf %8 : vector<32x128xf32> to vector<32x128xbf16>
    %10 = tpu.iota {dimensions = array<i32: 1>} : vector<2x128xi32>
    %c96_i32 = arith.constant 96 : i32
    %11 = vector.broadcast %c96_i32 : i32 to vector<2x128xi32>
    %12 = arith.cmpi slt, %10, %11 : vector<2x128xi32>
    %cst_8 = arith.constant 5.000000e-01 : f32
    %cst_9 = arith.constant 1.000000e+00 : f32
    %13 = vector.broadcast %cst_8 : f32 to vector<2x128xf32>
    %14 = vector.broadcast %cst_9 : f32 to vector<2x128xf32>
    %15 = arith.select %12, %13, %14 : vector<2x128xi1>, vector<2x128xf32>
    %cst_10 = arith.constant 5.000000e-01 : f32
    %cst_11 = arith.constant 0.000000e+00 : f32
    %16 = vector.broadcast %cst_10 : f32 to vector<2x128xf32>
    %17 = vector.broadcast %cst_11 : f32 to vector<2x128xf32>
    %18 = arith.select %12, %16, %17 : vector<2x128xi1>, vector<2x128xf32>
    %cst_12 = arith.constant 0.000000e+00 : f32
    %19 = vector.broadcast %cst_12 : f32 to vector<2x32xf32>
    %cst_13 = arith.constant 0.000000e+00 : f32
    %20 = vector.broadcast %cst_13 : f32 to vector<2x32xf32>
    %21 = vector.extract_strided_slice %7 {offsets = [0, 0, 0], sizes = [2, 1, 128], strides = [1, 1, 1]} : vector<2x8x128xf32> to vector<2x1x128xf32>
    %22 = vector.shape_cast %21 : vector<2x1x128xf32> to vector<2x128xf32>
    %23 = arith.truncf %19 : vector<2x32xf32> to vector<2x32xbf16>
    %cst_14 = arith.constant dense<0.000000e+00> : vector<2x128xf32>
    %24 = tpu.matmul %23, %9, %cst_14 {dimension_numbers = #tpu.dot_dimension_numbers<[1], [0], [0], [1], [0, 0, 1, 1], [], []>} : vector<2x32xbf16>, vector<32x128xbf16>, vector<2x128xf32> -> vector<2x128xf32>
    %25 = arith.addf %22, %24 : vector<2x128xf32>
    %26 = arith.mulf %25, %15 : vector<2x128xf32>
    %27 = math.tanh %26 : vector<2x128xf32>
    %28 = arith.mulf %27, %15 : vector<2x128xf32>
    %29 = arith.addf %28, %18 : vector<2x128xf32>
    %30 = vector.extract_strided_slice %29 {offsets = [0, 0], sizes = [2, 32], strides = [1, 1]} : vector<2x128xf32> to vector<2x32xf32>
    %31 = vector.extract_strided_slice %29 {offsets = [0, 32], sizes = [2, 32], strides = [1, 1]} : vector<2x128xf32> to vector<2x32xf32>
    %32 = vector.extract_strided_slice %29 {offsets = [0, 64], sizes = [2, 32], strides = [1, 1]} : vector<2x128xf32> to vector<2x32xf32>
    %33 = vector.extract_strided_slice %29 {offsets = [0, 96], sizes = [2, 32], strides = [1, 1]} : vector<2x128xf32> to vector<2x32xf32>
    %34 = arith.mulf %31, %20 : vector<2x32xf32>
    %35 = arith.mulf %30, %33 : vector<2x32xf32>
    %36 = arith.addf %34, %35 : vector<2x32xf32>
    %37 = math.tanh %36 : vector<2x32xf32>
    %38 = arith.mulf %32, %37 : vector<2x32xf32>
    %39 = vector.extract_strided_slice %7 {offsets = [0, 1, 0], sizes = [2, 1, 128], strides = [1, 1, 1]} : vector<2x8x128xf32> to vector<2x1x128xf32>
    %40 = vector.shape_cast %39 : vector<2x1x128xf32> to vector<2x128xf32>
    %41 = arith.truncf %38 : vector<2x32xf32> to vector<2x32xbf16>
    %cst_15 = arith.constant dense<0.000000e+00> : vector<2x128xf32>
    %42 = tpu.matmul %41, %9, %cst_15 {dimension_numbers = #tpu.dot_dimension_numbers<[1], [0], [0], [1], [0, 0, 1, 1], [], []>} : vector<2x32xbf16>, vector<32x128xbf16>, vector<2x128xf32> -> vector<2x128xf32>
    %43 = arith.addf %40, %42 : vector<2x128xf32>
    %44 = arith.mulf %43, %15 : vector<2x128xf32>
    %45 = math.tanh %44 : vector<2x128xf32>
    %46 = arith.mulf %45, %15 : vector<2x128xf32>
    %47 = arith.addf %46, %18 : vector<2x128xf32>
    %48 = vector.extract_strided_slice %47 {offsets = [0, 0], sizes = [2, 32], strides = [1, 1]} : vector<2x128xf32> to vector<2x32xf32>
    %49 = vector.extract_strided_slice %47 {offsets = [0, 32], sizes = [2, 32], strides = [1, 1]} : vector<2x128xf32> to vector<2x32xf32>
    %50 = vector.extract_strided_slice %47 {offsets = [0, 64], sizes = [2, 32], strides = [1, 1]} : vector<2x128xf32> to vector<2x32xf32>
    %51 = vector.extract_strided_slice %47 {offsets = [0, 96], sizes = [2, 32], strides = [1, 1]} : vector<2x128xf32> to vector<2x32xf32>
    %52 = arith.mulf %49, %36 : vector<2x32xf32>
    %53 = arith.mulf %48, %51 : vector<2x32xf32>
    %54 = arith.addf %52, %53 : vector<2x32xf32>
    %55 = math.tanh %54 : vector<2x32xf32>
    %56 = arith.mulf %50, %55 : vector<2x32xf32>
    %57 = vector.extract_strided_slice %7 {offsets = [0, 2, 0], sizes = [2, 1, 128], strides = [1, 1, 1]} : vector<2x8x128xf32> to vector<2x1x128xf32>
    %58 = vector.shape_cast %57 : vector<2x1x128xf32> to vector<2x128xf32>
    %59 = arith.truncf %56 : vector<2x32xf32> to vector<2x32xbf16>
    %cst_16 = arith.constant dense<0.000000e+00> : vector<2x128xf32>
    %60 = tpu.matmul %59, %9, %cst_16 {dimension_numbers = #tpu.dot_dimension_numbers<[1], [0], [0], [1], [0, 0, 1, 1], [], []>} : vector<2x32xbf16>, vector<32x128xbf16>, vector<2x128xf32> -> vector<2x128xf32>
    %61 = arith.addf %58, %60 : vector<2x128xf32>
    %62 = arith.mulf %61, %15 : vector<2x128xf32>
    %63 = math.tanh %62 : vector<2x128xf32>
    %64 = arith.mulf %63, %15 : vector<2x128xf32>
    %65 = arith.addf %64, %18 : vector<2x128xf32>
    %66 = vector.extract_strided_slice %65 {offsets = [0, 0], sizes = [2, 32], strides = [1, 1]} : vector<2x128xf32> to vector<2x32xf32>
    %67 = vector.extract_strided_slice %65 {offsets = [0, 32], sizes = [2, 32], strides = [1, 1]} : vector<2x128xf32> to vector<2x32xf32>
    %68 = vector.extract_strided_slice %65 {offsets = [0, 64], sizes = [2, 32], strides = [1, 1]} : vector<2x128xf32> to vector<2x32xf32>
    %69 = vector.extract_strided_slice %65 {offsets = [0, 96], sizes = [2, 32], strides = [1, 1]} : vector<2x128xf32> to vector<2x32xf32>
    %70 = arith.mulf %67, %54 : vector<2x32xf32>
    %71 = arith.mulf %66, %69 : vector<2x32xf32>
    %72 = arith.addf %70, %71 : vector<2x32xf32>
    %73 = math.tanh %72 : vector<2x32xf32>
    %74 = arith.mulf %68, %73 : vector<2x32xf32>
    %75 = vector.extract_strided_slice %7 {offsets = [0, 3, 0], sizes = [2, 1, 128], strides = [1, 1, 1]} : vector<2x8x128xf32> to vector<2x1x128xf32>
    %76 = vector.shape_cast %75 : vector<2x1x128xf32> to vector<2x128xf32>
    %77 = arith.truncf %74 : vector<2x32xf32> to vector<2x32xbf16>
    %cst_17 = arith.constant dense<0.000000e+00> : vector<2x128xf32>
    %78 = tpu.matmul %77, %9, %cst_17 {dimension_numbers = #tpu.dot_dimension_numbers<[1], [0], [0], [1], [0, 0, 1, 1], [], []>} : vector<2x32xbf16>, vector<32x128xbf16>, vector<2x128xf32> -> vector<2x128xf32>
    %79 = arith.addf %76, %78 : vector<2x128xf32>
    %80 = arith.mulf %79, %15 : vector<2x128xf32>
    %81 = math.tanh %80 : vector<2x128xf32>
    %82 = arith.mulf %81, %15 : vector<2x128xf32>
    %83 = arith.addf %82, %18 : vector<2x128xf32>
    %84 = vector.extract_strided_slice %83 {offsets = [0, 0], sizes = [2, 32], strides = [1, 1]} : vector<2x128xf32> to vector<2x32xf32>
    %85 = vector.extract_strided_slice %83 {offsets = [0, 32], sizes = [2, 32], strides = [1, 1]} : vector<2x128xf32> to vector<2x32xf32>
    %86 = vector.extract_strided_slice %83 {offsets = [0, 64], sizes = [2, 32], strides = [1, 1]} : vector<2x128xf32> to vector<2x32xf32>
    %87 = vector.extract_strided_slice %83 {offsets = [0, 96], sizes = [2, 32], strides = [1, 1]} : vector<2x128xf32> to vector<2x32xf32>
    %88 = arith.mulf %85, %72 : vector<2x32xf32>
    %89 = arith.mulf %84, %87 : vector<2x32xf32>
    %90 = arith.addf %88, %89 : vector<2x32xf32>
    %91 = math.tanh %90 : vector<2x32xf32>
    %92 = arith.mulf %86, %91 : vector<2x32xf32>
    %93 = vector.extract_strided_slice %7 {offsets = [0, 4, 0], sizes = [2, 1, 128], strides = [1, 1, 1]} : vector<2x8x128xf32> to vector<2x1x128xf32>
    %94 = vector.shape_cast %93 : vector<2x1x128xf32> to vector<2x128xf32>
    %95 = arith.truncf %92 : vector<2x32xf32> to vector<2x32xbf16>
    %cst_18 = arith.constant dense<0.000000e+00> : vector<2x128xf32>
    %96 = tpu.matmul %95, %9, %cst_18 {dimension_numbers = #tpu.dot_dimension_numbers<[1], [0], [0], [1], [0, 0, 1, 1], [], []>} : vector<2x32xbf16>, vector<32x128xbf16>, vector<2x128xf32> -> vector<2x128xf32>
    %97 = arith.addf %94, %96 : vector<2x128xf32>
    %98 = arith.mulf %97, %15 : vector<2x128xf32>
    %99 = math.tanh %98 : vector<2x128xf32>
    %100 = arith.mulf %99, %15 : vector<2x128xf32>
    %101 = arith.addf %100, %18 : vector<2x128xf32>
    %102 = vector.extract_strided_slice %101 {offsets = [0, 0], sizes = [2, 32], strides = [1, 1]} : vector<2x128xf32> to vector<2x32xf32>
    %103 = vector.extract_strided_slice %101 {offsets = [0, 32], sizes = [2, 32], strides = [1, 1]} : vector<2x128xf32> to vector<2x32xf32>
    %104 = vector.extract_strided_slice %101 {offsets = [0, 64], sizes = [2, 32], strides = [1, 1]} : vector<2x128xf32> to vector<2x32xf32>
    %105 = vector.extract_strided_slice %101 {offsets = [0, 96], sizes = [2, 32], strides = [1, 1]} : vector<2x128xf32> to vector<2x32xf32>
    %106 = arith.mulf %103, %90 : vector<2x32xf32>
    %107 = arith.mulf %102, %105 : vector<2x32xf32>
    %108 = arith.addf %106, %107 : vector<2x32xf32>
    %109 = math.tanh %108 : vector<2x32xf32>
    %110 = arith.mulf %104, %109 : vector<2x32xf32>
    %111 = vector.extract_strided_slice %7 {offsets = [0, 5, 0], sizes = [2, 1, 128], strides = [1, 1, 1]} : vector<2x8x128xf32> to vector<2x1x128xf32>
    %112 = vector.shape_cast %111 : vector<2x1x128xf32> to vector<2x128xf32>
    %113 = arith.truncf %110 : vector<2x32xf32> to vector<2x32xbf16>
    %cst_19 = arith.constant dense<0.000000e+00> : vector<2x128xf32>
    %114 = tpu.matmul %113, %9, %cst_19 {dimension_numbers = #tpu.dot_dimension_numbers<[1], [0], [0], [1], [0, 0, 1, 1], [], []>} : vector<2x32xbf16>, vector<32x128xbf16>, vector<2x128xf32> -> vector<2x128xf32>
    %115 = arith.addf %112, %114 : vector<2x128xf32>
    %116 = arith.mulf %115, %15 : vector<2x128xf32>
    %117 = math.tanh %116 : vector<2x128xf32>
    %118 = arith.mulf %117, %15 : vector<2x128xf32>
    %119 = arith.addf %118, %18 : vector<2x128xf32>
    %120 = vector.extract_strided_slice %119 {offsets = [0, 0], sizes = [2, 32], strides = [1, 1]} : vector<2x128xf32> to vector<2x32xf32>
    %121 = vector.extract_strided_slice %119 {offsets = [0, 32], sizes = [2, 32], strides = [1, 1]} : vector<2x128xf32> to vector<2x32xf32>
    %122 = vector.extract_strided_slice %119 {offsets = [0, 64], sizes = [2, 32], strides = [1, 1]} : vector<2x128xf32> to vector<2x32xf32>
    %123 = vector.extract_strided_slice %119 {offsets = [0, 96], sizes = [2, 32], strides = [1, 1]} : vector<2x128xf32> to vector<2x32xf32>
    %124 = arith.mulf %121, %108 : vector<2x32xf32>
    %125 = arith.mulf %120, %123 : vector<2x32xf32>
    %126 = arith.addf %124, %125 : vector<2x32xf32>
    %127 = math.tanh %126 : vector<2x32xf32>
    %128 = arith.mulf %122, %127 : vector<2x32xf32>
    %129 = vector.extract_strided_slice %7 {offsets = [0, 6, 0], sizes = [2, 1, 128], strides = [1, 1, 1]} : vector<2x8x128xf32> to vector<2x1x128xf32>
    %130 = vector.shape_cast %129 : vector<2x1x128xf32> to vector<2x128xf32>
    %131 = arith.truncf %128 : vector<2x32xf32> to vector<2x32xbf16>
    %cst_20 = arith.constant dense<0.000000e+00> : vector<2x128xf32>
    %132 = tpu.matmul %131, %9, %cst_20 {dimension_numbers = #tpu.dot_dimension_numbers<[1], [0], [0], [1], [0, 0, 1, 1], [], []>} : vector<2x32xbf16>, vector<32x128xbf16>, vector<2x128xf32> -> vector<2x128xf32>
    %133 = arith.addf %130, %132 : vector<2x128xf32>
    %134 = arith.mulf %133, %15 : vector<2x128xf32>
    %135 = math.tanh %134 : vector<2x128xf32>
    %136 = arith.mulf %135, %15 : vector<2x128xf32>
    %137 = arith.addf %136, %18 : vector<2x128xf32>
    %138 = vector.extract_strided_slice %137 {offsets = [0, 0], sizes = [2, 32], strides = [1, 1]} : vector<2x128xf32> to vector<2x32xf32>
    %139 = vector.extract_strided_slice %137 {offsets = [0, 32], sizes = [2, 32], strides = [1, 1]} : vector<2x128xf32> to vector<2x32xf32>
    %140 = vector.extract_strided_slice %137 {offsets = [0, 64], sizes = [2, 32], strides = [1, 1]} : vector<2x128xf32> to vector<2x32xf32>
    %141 = vector.extract_strided_slice %137 {offsets = [0, 96], sizes = [2, 32], strides = [1, 1]} : vector<2x128xf32> to vector<2x32xf32>
    %142 = arith.mulf %139, %126 : vector<2x32xf32>
    %143 = arith.mulf %138, %141 : vector<2x32xf32>
    %144 = arith.addf %142, %143 : vector<2x32xf32>
    %145 = math.tanh %144 : vector<2x32xf32>
    %146 = arith.mulf %140, %145 : vector<2x32xf32>
    %147 = vector.extract_strided_slice %7 {offsets = [0, 7, 0], sizes = [2, 1, 128], strides = [1, 1, 1]} : vector<2x8x128xf32> to vector<2x1x128xf32>
    %148 = vector.shape_cast %147 : vector<2x1x128xf32> to vector<2x128xf32>
    %149 = arith.truncf %146 : vector<2x32xf32> to vector<2x32xbf16>
    %cst_21 = arith.constant dense<0.000000e+00> : vector<2x128xf32>
    %150 = tpu.matmul %149, %9, %cst_21 {dimension_numbers = #tpu.dot_dimension_numbers<[1], [0], [0], [1], [0, 0, 1, 1], [], []>} : vector<2x32xbf16>, vector<32x128xbf16>, vector<2x128xf32> -> vector<2x128xf32>
    %151 = arith.addf %148, %150 : vector<2x128xf32>
    %152 = arith.mulf %151, %15 : vector<2x128xf32>
    %153 = math.tanh %152 : vector<2x128xf32>
    %154 = arith.mulf %153, %15 : vector<2x128xf32>
    %155 = arith.addf %154, %18 : vector<2x128xf32>
    %156 = vector.extract_strided_slice %155 {offsets = [0, 0], sizes = [2, 32], strides = [1, 1]} : vector<2x128xf32> to vector<2x32xf32>
    %157 = vector.extract_strided_slice %155 {offsets = [0, 32], sizes = [2, 32], strides = [1, 1]} : vector<2x128xf32> to vector<2x32xf32>
    %158 = vector.extract_strided_slice %155 {offsets = [0, 64], sizes = [2, 32], strides = [1, 1]} : vector<2x128xf32> to vector<2x32xf32>
    %159 = vector.extract_strided_slice %155 {offsets = [0, 96], sizes = [2, 32], strides = [1, 1]} : vector<2x128xf32> to vector<2x32xf32>
    %160 = arith.mulf %157, %144 : vector<2x32xf32>
    %161 = arith.mulf %156, %159 : vector<2x32xf32>
    %162 = arith.addf %160, %161 : vector<2x32xf32>
    %163 = math.tanh %162 : vector<2x32xf32>
    %164 = arith.mulf %158, %163 : vector<2x32xf32>
    %c0_22 = arith.constant 0 : index
    %c0_23 = arith.constant 0 : index
    %165 = vector.load %arg4[%c0_22, %c0_23] : memref<32x6xf32, #tpu.memory_space<vmem>>, vector<32x6xf32>
    %cst_24 = arith.constant dense<0.000000e+00> : vector<2x6xf32>
    %166 = tpu.matmul %164, %165, %cst_24 {dimension_numbers = #tpu.dot_dimension_numbers<[1], [0], [0], [1], [0, 0, 1, 1], [], []>} : vector<2x32xf32>, vector<32x6xf32>, vector<2x6xf32> -> vector<2x6xf32>
    %c0_25 = arith.constant 0 : index
    %c0_26 = arith.constant 0 : index
    %167 = vector.load %arg5[%c0_25, %c0_26] : memref<1x6xf32, #tpu.memory_space<vmem>>, vector<1x6xf32>
    %168 = vector.broadcast %167 : vector<1x6xf32> to vector<2x6xf32>
    %169 = arith.addf %166, %168 : vector<2x6xf32>
    %c0_27 = arith.constant 0 : index
    %c0_28 = arith.constant 0 : index
    %170 = vector.load %arg6[%c0_27, %c0_28] : memref<2x6xf32, #tpu.memory_space<vmem>>, vector<2x6xf32>
    tpu.vector_store %arg6[%c0_27, %c0_28], %169 {strides = array<i32>} : memref<2x6xf32, #tpu.memory_space<vmem>>, vector<2x6xf32>,
    return
  }
}

</mosaic_0001>

<bundles_post_ra>
// kernel: stock2_forward_fused.1
= control target key start
LH: loop header
LB: loop body
LE: loop exit
PB: predicated region body
PF: predicated region fallthrough
CT: control target
= control target key end

     0   :  { %11 = vsyncpa [#allocation3], 0  ;;  %s1666_s0 = inlined_call_operand.hbm [shape: f32[2,8,8], index: 0, kind: input, shape index: {}]   ;;  %s1667_s1 = inlined_call_operand.vmem [shape: f32[8,128], index: 1, kind: input, shape index: {}]   ;;  %s1668_s2 = inlined_call_operand.vmem [shape: f32[32,128], index: 2, kind: input, shape index: {}]   ;;  %s1669_s3 = inlined_call_operand.vmem [shape: f32[1,128], index: 3, kind: input, shape index: {}]   ;;  %s1670_s4 = inlined_call_operand.vmem [shape: f32[32,6], index: 4, kind: input, shape index: {}]   ;;  %s1671_s5 = inlined_call_operand.vmem [shape: f32[1,6], index: 5, kind: input, shape index: {}]   ;;  %s1672_s6 = inlined_call_operand.hbm [shape: f32[2,6], index: 6, kind: output, shape index: {}]  }
   0x1   :  { %12 = vsyncpa [#allocation4], 0  ;;  %s1362_s21 = smov [#allocation2]   ;;  %s1314_s25 = scalar_lea.hbm %s1666_s0, 256 }
   0x2   :  { %s18_s22 = sshll.u32 %s1362_s21, 4  ;;  %p1315_p0 = scmp.ne.s32.totalorder %s1666_s0, %s1314_s25  ;;  %s19_s22 = int_to_ptr.vmem [resolvable:$true] %s18_s22 }
   0x3   :  { %p1318_p1 = scmp.lt.u32.totalorder %s1314_s25, %s1666_s0 }
   0x5   :  { %p1320_p2 = pnand %p1318_p1, %p1315_p0 }
   0x7   :  { %1323 = shalt.err (!%p1320_p2)
}
   0x8   :  { %s1324_s30 = scalar_lea.vmem %s19_s22, 256  ;;  %p1329_p4 = scmp.lt.s32.totalorder %s19_s22, %s19_s22 }
   0x9   :  { %p1325_p3 = scmp.ne.s32.totalorder %s19_s22, %s1324_s30  ;;  %p1330_p5 = scmp.lt.s32.totalorder %s1324_s30, %s1324_s30 }
   0xb   :  { %p1331_p6 = por %p1330_p5, %p1329_p4 }
   0xd   :  { %p1332_p7 = pnand %p1331_p6, %p1325_p3 }
   0xf   :  { %1335 = shalt.err (!%p1332_p7)
}
  0x10   :  { %s1363_s7 = smov 128   ;;  %s1364_s8 = smov 8  }
  0x11   :  { %24 = dma.hbm_to_vmem [thread:$0]  %s1666_s0, 256, %s19_s22, [#allocation3], %s1363_s7, %s1363_s7, %s1364_s8  }
  0x12   :  { %1358 = dma.done.wait [#allocation3], 256  }
  0x13   :  { %1359 = vsyncadd [#allocation3], 4294967040  ;;  %v1365_v0 = vmov 0.0   ;;  %vm1366_vm0 = vmmov 0   ;;  %vm49_vm1 = vcmask 64512   ;;  %v131_v1 = vld [vmem:[%s1668_s2] sm:$0xff]  ;;  %v137_v11 = vlaneseq }
  0x14   :  { %1158 = vmatprep.subr.bf16.mxu1 %v1365_v0  ;;  %1162 = vmatprep.mubr.msk.bf16.mxu1 %vm1366_vm0, %v1365_v0  ;;  %v132_v2 = vld [vmem:[%s1668_s2 + $0x8] sm:$0xff]  ;;  %v41_v3 = vld [vmem:[%s1667_s1] sm:$0xff]  ;;  %v133_v7 = vld [vmem:[%s1668_s2 + $0x10] sm:$0xff]  ;;  %v1367_v10 = vmov 0   ;;  %v1368_v18 = vmov 1.0   ;;  %vm241_vm3 = vcmask 1041409  }
  0x15   :  { %v1432_v4 = vpack.c.bf16 %v132_v2, %v131_v1  ;;  %1153 = vmatprep.subr.mxu0 %v41_v3  ;;  %v39_v5 = vld [vmem:[#allocation2] sm:$0xff]  ;;  %v40_v6 = vld [vmem:[#allocation2 + $0x8] sm:$0xff]  ;;  %v134_v8 = vld [vmem:[%s1668_s2 + $0x18] sm:$0xff]  ;;  %v138_v13 = vand.u32 127, %v137_v11  ;;  %s1370_s20 = smov 64   ;;  %vm142_vm4 = vcmask 261120  }
  0x16   :  { %1154 = vmatpush3.msra.mxu0 %v41_v3  ;;  %1155 = vmatprep.mubr.msk.f32.mxu0 %vm49_vm1, %v39_v5  ;;  %v1441_v9 = vpack.c.bf16 %v134_v8, %v133_v7  ;;  %v1109_v14 = vld [vmem:[%s1669_s3] ss:$0 sm:$0xff]  ;;  %s1369_s3 = smov 32   ;;  %s1372_s30 = smov [#allocation5]   ;;  %vm1092_vm5 = vcmask 41984  }
  0x17   :  { %1159 = vmatpush3.bf16.msra.mxu1 %v1432_v4  ;;  %1156 = vmatmul.mubr.msk.f32.vlgmr.msra.gmra.mrb[0].mxu0 %vm49_vm1, %v40_v6  ;;  %vm139_vm2 = vcmp.lt.s32.totalorder %v138_v13, 96  ;;  %s1100_s7 = sshll.u32 %s1372_s30, 4  ;;  %s1101_s7 = int_to_ptr.vmem [resolvable:$true] %s1100_s7 }
  0x18   :  { %1160 = vmatprep.subr.bf16.mxu1 %v1365_v0  ;;  %1166 = vmatprep.subr.bf16.mxu0 %v1365_v0  ;;  %v1467_v19 = vsel %vm139_vm2, 0.5, %v1368_v18  ;;  %v1476_v32 = vsel %vm139_vm2, 0.5, %v1365_v0  ;;  %s1336_s8 = scalar_lea.vmem %s1101_s7, 32  ;;  %p1341_p9 = scmp.lt.s32.totalorder %s1101_s7, %s1101_s7 }
  0x19   :  { %1167 = vmatpush3.bf16.msra.mxu0 %v1432_v4  ;;  %1170 = vmatprep.mubr.msk.bf16.mxu0 %vm1366_vm0, %v1365_v0  ;;  %p1337_p8 = scmp.ne.s32.totalorder %s1101_s7, %s1336_s8  ;;  %p1342_p10 = scmp.lt.s32.totalorder %s1336_s8, %s1336_s8 }
  0x1a   :  { %1168 = vmatprep.subr.bf16.mxu0 %v1365_v0 }
  0x1b   :  { %1161 = vmatpush3.bf16.msra.mxu1 %v1441_v9  ;;  %p1343_p11 = por %p1342_p10, %p1341_p9 }
  0x1c   :  { %1174 = vmatprep.subr.bf16.mxu1 %v1365_v0 }
  0x1d   :  { %1169 = vmatpush3.bf16.msra.mxu0 %v1441_v9  ;;  %p1344_p12 = pnand %p1343_p11, %p1337_p8 }
  0x1e   :  { %1163 = vmatmul.mubr.bf16.vlgmr.msra.gmra.mrb[0].mxu1 %v1367_v10  ;;  %1182 = vmatprep.subr.bf16.mxu0 %v1365_v0 }
  0x1f   :  { %1175 = vmatpush3.bf16.msra.mxu1 %v1432_v4  ;;  %1178 = vmatprep.mubr.msk.bf16.mxu1 %vm1366_vm0, %v1365_v0 }
  0x20   :  { %1176 = vmatprep.subr.bf16.mxu1 %v1365_v0 }
  0x23   :  { %1177 = vmatpush3.bf16.msra.mxu1 %v1441_v9 }
  0x24   :  { %1190 = vmatprep.subr.bf16.mxu1 %v1365_v0 }
  0xea   :  { %v1157_v12 = vpop.f32.mrb[0].mxu0 }
  0xeb   :  { %v122_v15 = vpop.f32.mrb[1].mxu0  ;;  %v1464_v17 = vadd.f32 %v1157_v12, %v1109_v14 }
  0xec   :  { %v1462_v16 = vadd.f32 %v1109_v14, %v122_v15 }
  0xf1   :  { %v180_v20 = vpop.f32.mrb[0].mxu1 }
  0xf2   :  { %v187_v21 = vrot.slane %v180_v20, 1  ;;  %v190_v22 = vadd.f32 %v180_v20, %v1462_v16  ;;  %v1164_v23 = vpop.f32.mrb[1].mxu1 }
  0xf3   :  { %v183_v24 = vpop.f32.mrb[2].mxu1 }
  0xf4   :  { %v191_v25 = vadd.f32 %v187_v21, %v1464_v17  ;;  %v192_v26 = vmul.f32 %v190_v22, %v1467_v19  ;;  %v1165_v27 = vpop.f32.mrb[3].mxu1 }
  0xf6   :  { %v193_v28 = vmul.f32 %v191_v25, %v1467_v19  ;;  %1250 = vtanh.f32 %v192_v26 }
  0xf8   :  { %1252 = vtanh.f32 %v193_v28 }
 0x100   :  { %v1251_v29 = vpop.eup %1250 }
 0x101   :  { %v196_v34 = vmul.f32 %v1251_v29, %v1467_v19 }
 0x102   :  { %v1253_v30 = vpop.eup %1252 }
 0x103   :  { %v197_v31 = vmul.f32 %v1253_v30, %v1467_v19  ;;  %v198_v35 = vadd.f32 %v196_v34, %v1476_v32 }
 0x105   :  { %v199_v33 = vadd.f32 %v197_v31, %v1476_v32  ;;  %v200_v43 = vmul.f32 0.0, %v198_v35 }
 0x107   :  { %206 = vrot.lane.b32.xlu0 %v199_v33, %s1369_s3  ;;  %v201_v40 = vmul.f32 0.0, %v199_v33 }
 0x10b   :  { %204 = vrot.lane.b32.xlu0 %v198_v35, %s1369_s3 }
 0x179   :  { %v207_v36 = vpop.permute.xlu0 %206 }
 0x17a   :  { %v211_v37 = vmul.f32 %v207_v36, %v199_v33 }
 0x17c   :  { %216 = vrot.lane.b32.xlu1 %v211_v37, %s1369_s3 }
 0x17d   :  { %v205_v38 = vpop.permute.xlu0 %204 }
 0x17e   :  { %v210_v39 = vmul.f32 %v205_v38, %v198_v35 }
 0x180   :  { %214 = vrot.lane.b32.xlu1 %v210_v39, %s1369_s3 }
 0x1ee   :  { %v217_v41 = vpop.permute.xlu1 %216 }
 0x1ef   :  { %v221_v42 = vadd.f32 %v217_v41, %v201_v40 }
 0x1f1   :  { %1254 = vtanh.f32 %v221_v42  ;;  %v306_v21 = vrot.slane %v221_v42, 7 }
 0x1f2   :  { %v215_v44 = vpop.permute.xlu1 %214 }
 0x1f3   :  { %v220_v45 = vadd.f32 %v215_v44, %v200_v43 }
 0x1f5   :  { %1256 = vtanh.f32 %v220_v45  ;;  %v305_v22 = vrot.slane %v220_v45, 7 }
 0x1fb   :  { %v1255_v46 = vpop.eup %1254 }
 0x1fc   :  { %228 = vrot.lane.b32.xlu0 %v1255_v46, %s1369_s3 }
 0x1ff   :  { %v1257_v47 = vpop.eup %1256 }
 0x200   :  { %226 = vrot.lane.b32.xlu1 %v1257_v47, %s1369_s3 }
 0x26e   :  { %v229_v48 = vpop.permute.xlu0 %228 }
 0x26f   :  { %v233_v49 = vmul.f32 %v229_v48, %v199_v33 }
 0x271   :  { %v235_v50 = vpack.c.bf16 %v233_v49, %v233_v49 }
 0x272   :  { %v227_v51 = vpop.permute.xlu1 %226 }
 0x273   :  { %v239_v52 = vunpack.c.l.b16 %v235_v50  ;;  %v232_v53 = vmul.f32 %v227_v51, %v198_v35 }
 0x275   :  { %v234_v54 = vpack.c.bf16 %v232_v53, %v232_v53  ;;  %v240_v55 = vrot.slane %v239_v52, 7 }
 0x277   :  { %v238_v56 = vunpack.c.l.b16 %v234_v54 }
 0x279   :  { %v242_v57 = vsel %vm241_vm3, %v240_v55, %v238_v56 }
 0x27a   :  { %v243_v58 = vpack.c.b16 %v242_v57, %v242_v57 }
 0x27c   :  { %244 = vrot.lane.b32.xlu0 %v243_v58, %s1370_s20 }
 0x2ee   :  { %v245_v59 = vpop.permute.xlu0 %244 }
 0x2ef   :  { %1171 = vmatmul.mubr.msk.bf16.vlgmr.msra.gmra.mrb[4].mxu0 %vm142_vm4, %v245_v59 }
 0x2f0   :  { %1183 = vmatpush3.bf16.msra.mxu0 %v1432_v4  ;;  %1186 = vmatprep.mubr.msk.bf16.mxu0 %vm1366_vm0, %v1365_v0 }
 0x2f1   :  { %1184 = vmatprep.subr.bf16.mxu0 %v1365_v0 }
 0x2f4   :  { %1185 = vmatpush3.bf16.msra.mxu0 %v1441_v9 }
 0x2f5   :  { %1198 = vmatprep.subr.bf16.mxu0 %v1365_v0 }
 0x3c2   :  { %v283_v60 = vpop.f32.mrb[4].mxu0 }
 0x3c3   :  { %v290_v61 = vrot.slane %v283_v60, 7  ;;  %v294_v62 = vadd.f32 %v283_v60, %v1464_v17  ;;  %v1172_v63 = vpop.f32.mrb[5].mxu0 }
 0x3c4   :  { %v286_v1 = vpop.f32.mrb[6].mxu0 }
 0x3c5   :  { %v293_v2 = vadd.f32 %v290_v61, %v1462_v16  ;;  %v296_v3 = vmul.f32 %v294_v62, %v1467_v19  ;;  %v1173_v5 = vpop.f32.mrb[7].mxu0 }
 0x3c7   :  { %v295_v6 = vmul.f32 %v293_v2, %v1467_v19  ;;  %1258 = vtanh.f32 %v296_v3 }
 0x3c9   :  { %1260 = vtanh.f32 %v295_v6 }
 0x3d1   :  { %v1259_v7 = vpop.eup %1258 }
 0x3d2   :  { %v300_v8 = vmul.f32 %v1259_v7, %v1467_v19 }
 0x3d3   :  { %v1261_v10 = vpop.eup %1260 }
 0x3d4   :  { %v302_v11 = vadd.f32 %v300_v8, %v1476_v32  ;;  %v299_v12 = vmul.f32 %v1261_v10, %v1467_v19 }
 0x3d6   :  { %315 = vrot.lane.b32.xlu0 %v302_v11, %s1369_s3  ;;  %v301_v13 = vadd.f32 %v299_v12, %v1476_v32  ;;  %v310_v23 = vmul.f32 %v306_v21, %v302_v11 }
 0x3d8   :  { %313 = vrot.lane.b32.xlu1 %v301_v13, %s1369_s3  ;;  %v309_v26 = vmul.f32 %v305_v22, %v301_v13 }
 0x448   :  { %v316_v14 = vpop.permute.xlu0 %315 }
 0x449   :  { %v320_v15 = vmul.f32 %v316_v14, %v302_v11 }
 0x44a   :  { %v314_v18 = vpop.permute.xlu1 %313 }
 0x44b   :  { %v319_v20 = vmul.f32 %v314_v18, %v301_v13  ;;  %325 = vrot.lane.b32.xlu0 %v320_v15, %s1369_s3 }
 0x44d   :  { %323 = vrot.lane.b32.xlu1 %v319_v20, %s1369_s3 }
 0x4bd   :  { %v326_v24 = vpop.permute.xlu0 %325 }
 0x4be   :  { %v330_v25 = vadd.f32 %v326_v24, %v310_v23 }
 0x4bf   :  { %v324_v27 = vpop.permute.xlu1 %323 }
 0x4c0   :  { %1262 = vtanh.f32 %v330_v25  ;;  %v329_v28 = vadd.f32 %v324_v27, %v309_v26  ;;  %v415_v2 = vrot.slane %v330_v25, 7 }
 0x4c2   :  { %1264 = vtanh.f32 %v329_v28  ;;  %v414_v1 = vrot.slane %v329_v28, 7 }
 0x4ca   :  { %v1263_v29 = vpop.eup %1262 }
 0x4cb   :  { %337 = vrot.lane.b32.xlu0 %v1263_v29, %s1369_s3 }
 0x4cc   :  { %v1265_v30 = vpop.eup %1264 }
 0x4cd   :  { %335 = vrot.lane.b32.xlu1 %v1265_v30, %s1369_s3 }
 0x53d   :  { %v338_v31 = vpop.permute.xlu0 %337 }
 0x53e   :  { %v342_v33 = vmul.f32 %v338_v31, %v302_v11 }
 0x53f   :  { %v336_v34 = vpop.permute.xlu1 %335 }
 0x540   :  { %v341_v35 = vmul.f32 %v336_v34, %v301_v13  ;;  %v344_v36 = vpack.c.bf16 %v342_v33, %v342_v33 }
 0x542   :  { %v343_v37 = vpack.c.bf16 %v341_v35, %v341_v35  ;;  %v348_v39 = vunpack.c.l.b16 %v344_v36 }
 0x544   :  { %v347_v38 = vunpack.c.l.b16 %v343_v37 }
 0x546   :  { %v349_v40 = vrot.slane %v347_v38, 1 }
 0x548   :  { %v350_v41 = vsel %vm241_vm3, %v348_v39, %v349_v40 }
 0x549   :  { %v351_v42 = vpack.c.b16 %v350_v41, %v350_v41 }
 0x54b   :  { %352 = vrot.lane.b32.xlu1 %v351_v42, %s1370_s20 }
 0x5bd   :  { %v353_v43 = vpop.permute.xlu1 %352 }
 0x5be   :  { %1179 = vmatmul.mubr.msk.bf16.vlgmr.msra.gmra.mrb[4].mxu1 %vm142_vm4, %v353_v43 }
 0x5bf   :  { %1191 = vmatpush3.bf16.msra.mxu1 %v1432_v4  ;;  %1194 = vmatprep.mubr.msk.bf16.mxu1 %vm1366_vm0, %v1365_v0 }
 0x5c0   :  { %1192 = vmatprep.subr.bf16.mxu1 %v1365_v0 }
 0x5c3   :  { %1193 = vmatpush3.bf16.msra.mxu1 %v1441_v9 }
 0x5c4   :  { %1206 = vmatprep.subr.bf16.mxu1 %v1365_v0 }
 0x691   :  { %v391_v44 = vpop.f32.mrb[4].mxu1 }
 0x692   :  { %v398_v45 = vrot.slane %v391_v44, 6  ;;  %v399_v46 = vrot.slane %v391_v44, 7  ;;  %v1180_v47 = vpop.f32.mrb[5].mxu1 }
 0x693   :  { %v394_v48 = vpop.f32.mrb[6].mxu1 }
 0x694   :  { %v402_v49 = vadd.f32 %v398_v45, %v1462_v16  ;;  %v403_v50 = vadd.f32 %v399_v46, %v1464_v17  ;;  %v1181_v51 = vpop.f32.mrb[7].mxu1 }
 0x696   :  { %v404_v52 = vmul.f32 %v402_v49, %v1467_v19  ;;  %v405_v53 = vmul.f32 %v403_v50, %v1467_v19 }
 0x698   :  { %1266 = vtanh.f32 %v404_v52 }
 0x699   :  { %1268 = vtanh.f32 %v405_v53 }
 0x6a2   :  { %v1267_v54 = vpop.eup %1266 }
 0x6a3   :  { %v1269_v55 = vpop.eup %1268  ;;  %v408_v56 = vmul.f32 %v1267_v54, %v1467_v19 }
 0x6a4   :  { %v409_v57 = vmul.f32 %v1269_v55, %v1467_v19 }
 0x6a5   :  { %v410_v58 = vadd.f32 %v408_v56, %v1476_v32 }
 0x6a6   :  { %v411_v59 = vadd.f32 %v409_v57, %v1476_v32 }
 0x6a7   :  { %422 = vrot.lane.b32.xlu0 %v410_v58, %s1369_s3  ;;  %v418_v3 = vmul.f32 %v414_v1, %v410_v58 }
 0x6a8   :  { %424 = vrot.lane.b32.xlu1 %v411_v59, %s1369_s3  ;;  %v419_v5 = vmul.f32 %v415_v2, %v411_v59 }
 0x719   :  { %v423_v60 = vpop.permute.xlu0 %422 }
 0x71a   :  { %v425_v61 = vpop.permute.xlu1 %424  ;;  %v428_v62 = vmul.f32 %v423_v60, %v410_v58 }
 0x71b   :  { %v429_v63 = vmul.f32 %v425_v61, %v411_v59 }
 0x71c   :  { %432 = vrot.lane.b32.xlu0 %v428_v62, %s1369_s3 }
 0x71d   :  { %434 = vrot.lane.b32.xlu1 %v429_v63, %s1369_s3 }
 0x78e   :  { %v433_v6 = vpop.permute.xlu0 %432 }
 0x78f   :  { %v435_v7 = vpop.permute.xlu1 %434  ;;  %v438_v8 = vadd.f32 %v433_v6, %v418_v3 }
 0x790   :  { %v439_v10 = vadd.f32 %v435_v7, %v419_v5 }
 0x791   :  { %1270 = vtanh.f32 %v438_v8  ;;  %v524_v50 = vrot.slane %v438_v8, 7 }
 0x792   :  { %1272 = vtanh.f32 %v439_v10  ;;  %v525_v51 = vrot.slane %v439_v10, 7 }
 0x79b   :  { %v1271_v11 = vpop.eup %1270 }
 0x79c   :  { %v1273_v12 = vpop.eup %1272  ;;  %444 = vrot.lane.b32.xlu0 %v1271_v11, %s1369_s3 }
 0x79d   :  { %446 = vrot.lane.b32.xlu1 %v1273_v12, %s1369_s3 }
 0x80e   :  { %v445_v13 = vpop.permute.xlu0 %444 }
 0x80f   :  { %v447_v14 = vpop.permute.xlu1 %446  ;;  %v450_v15 = vmul.f32 %v445_v13, %v410_v58 }
 0x810   :  { %v451_v18 = vmul.f32 %v447_v14, %v411_v59 }
 0x811   :  { %v452_v20 = vpack.c.bf16 %v450_v15, %v450_v15 }
 0x812   :  { %v453_v21 = vpack.c.bf16 %v451_v18, %v451_v18 }
 0x813   :  { %v456_v22 = vunpack.c.l.b16 %v452_v20 }
 0x814   :  { %v457_v23 = vunpack.c.l.b16 %v453_v21 }
 0x815   :  { %v458_v24 = vrot.slane %v456_v22, 2 }
 0x816   :  { %v459_v25 = vrot.slane %v457_v23, 1 }
 0x818   :  { %v460_v26 = vsel %vm241_vm3, %v459_v25, %v458_v24 }
 0x819   :  { %v461_v27 = vpack.c.b16 %v460_v26, %v460_v26 }
 0x81b   :  { %462 = vrot.lane.b32.xlu0 %v461_v27, %s1370_s20 }
 0x88d   :  { %v463_v28 = vpop.permute.xlu0 %462 }
 0x88e   :  { %1187 = vmatmul.mubr.msk.bf16.vlgmr.msra.gmra.mrb[8].mxu0 %vm142_vm4, %v463_v28 }
 0x88f   :  { %1199 = vmatpush3.bf16.msra.mxu0 %v1432_v4  ;;  %1202 = vmatprep.mubr.msk.bf16.mxu0 %vm1366_vm0, %v1365_v0 }
 0x890   :  { %1200 = vmatprep.subr.bf16.mxu0 %v1365_v0 }
 0x893   :  { %1201 = vmatpush3.bf16.msra.mxu0 %v1441_v9 }
 0x894   :  { %1214 = vmatprep.subr.bf16.mxu0 %v1365_v0 }
 0x961   :  { %v501_v29 = vpop.f32.mrb[8].mxu0 }
 0x962   :  { %v508_v30 = vrot.slane %v501_v29, 5  ;;  %v509_v31 = vrot.slane %v501_v29, 6  ;;  %v1188_v33 = vpop.f32.mrb[9].mxu0 }
 0x963   :  { %v504_v34 = vpop.f32.mrb[10].mxu0 }
 0x964   :  { %v512_v35 = vadd.f32 %v508_v30, %v1462_v16  ;;  %v513_v36 = vadd.f32 %v509_v31, %v1464_v17  ;;  %v1189_v37 = vpop.f32.mrb[11].mxu0 }
 0x966   :  { %v514_v38 = vmul.f32 %v512_v35, %v1467_v19  ;;  %v515_v39 = vmul.f32 %v513_v36, %v1467_v19 }
 0x968   :  { %1274 = vtanh.f32 %v514_v38 }
 0x969   :  { %1276 = vtanh.f32 %v515_v39 }
 0x972   :  { %v1275_v40 = vpop.eup %1274 }
 0x973   :  { %v1277_v41 = vpop.eup %1276  ;;  %v518_v42 = vmul.f32 %v1275_v40, %v1467_v19 }
 0x974   :  { %v519_v43 = vmul.f32 %v1277_v41, %v1467_v19 }
 0x975   :  { %v520_v44 = vadd.f32 %v518_v42, %v1476_v32 }
 0x976   :  { %v521_v45 = vadd.f32 %v519_v43, %v1476_v32 }
 0x977   :  { %532 = vrot.lane.b32.xlu1 %v520_v44, %s1369_s3  ;;  %v528_v52 = vmul.f32 %v524_v50, %v520_v44 }
 0x978   :  { %534 = vrot.lane.b32.xlu0 %v521_v45, %s1369_s3  ;;  %v529_v53 = vmul.f32 %v525_v51, %v521_v45 }
 0x9e9   :  { %v533_v46 = vpop.permute.xlu1 %532 }
 0x9ea   :  { %v535_v47 = vpop.permute.xlu0 %534  ;;  %v538_v48 = vmul.f32 %v533_v46, %v520_v44 }
 0x9eb   :  { %v539_v49 = vmul.f32 %v535_v47, %v521_v45 }
 0x9ec   :  { %542 = vrot.lane.b32.xlu1 %v538_v48, %s1369_s3 }
 0x9ed   :  { %544 = vrot.lane.b32.xlu0 %v539_v49, %s1369_s3 }
 0xa5e   :  { %v543_v54 = vpop.permute.xlu1 %542 }
 0xa5f   :  { %v545_v55 = vpop.permute.xlu0 %544  ;;  %v548_v56 = vadd.f32 %v543_v54, %v528_v52 }
 0xa60   :  { %v549_v57 = vadd.f32 %v545_v55, %v529_v53 }
 0xa61   :  { %1278 = vtanh.f32 %v548_v56  ;;  %v634_v36 = vrot.slane %v548_v56, 7 }
 0xa62   :  { %1280 = vtanh.f32 %v549_v57  ;;  %v635_v37 = vrot.slane %v549_v57, 7 }
 0xa6b   :  { %v1279_v58 = vpop.eup %1278 }
 0xa6c   :  { %v1281_v59 = vpop.eup %1280  ;;  %554 = vrot.lane.b32.xlu1 %v1279_v58, %s1369_s3 }
 0xa6d   :  { %556 = vrot.lane.b32.xlu0 %v1281_v59, %s1369_s3 }
 0xade   :  { %v555_v60 = vpop.permute.xlu1 %554 }
 0xadf   :  { %v557_v61 = vpop.permute.xlu0 %556  ;;  %v560_v62 = vmul.f32 %v555_v60, %v520_v44 }
 0xae0   :  { %v561_v63 = vmul.f32 %v557_v61, %v521_v45 }
 0xae1   :  { %v562_v1 = vpack.c.bf16 %v560_v62, %v560_v62 }
 0xae2   :  { %v563_v2 = vpack.c.bf16 %v561_v63, %v561_v63 }
 0xae3   :  { %v566_v3 = vunpack.c.l.b16 %v562_v1 }
 0xae4   :  { %v567_v5 = vunpack.c.l.b16 %v563_v2 }
 0xae5   :  { %v568_v6 = vrot.slane %v566_v3, 3 }
 0xae6   :  { %v569_v7 = vrot.slane %v567_v5, 2 }
 0xae8   :  { %v570_v8 = vsel %vm241_vm3, %v569_v7, %v568_v6 }
 0xae9   :  { %v571_v10 = vpack.c.b16 %v570_v8, %v570_v8 }
 0xaeb   :  { %572 = vrot.lane.b32.xlu1 %v571_v10, %s1370_s20 }
 0xb5d   :  { %v573_v11 = vpop.permute.xlu1 %572 }
 0xb5e   :  { %1195 = vmatmul.mubr.msk.bf16.vlgmr.msra.gmra.mrb[8].mxu1 %vm142_vm4, %v573_v11 }
 0xb5f   :  { %1207 = vmatpush3.bf16.msra.mxu1 %v1432_v4  ;;  %1210 = vmatprep.mubr.msk.bf16.mxu1 %vm1366_vm0, %v1365_v0 }
 0xb60   :  { %1208 = vmatprep.subr.bf16.mxu1 %v1365_v0 }
 0xb63   :  { %1209 = vmatpush3.bf16.msra.mxu1 %v1441_v9 }
 0xc31   :  { %v611_v12 = vpop.f32.mrb[8].mxu1 }
 0xc32   :  { %v618_v13 = vrot.slane %v611_v12, 4  ;;  %v619_v14 = vrot.slane %v611_v12, 5  ;;  %v1196_v15 = vpop.f32.mrb[9].mxu1 }
 0xc33   :  { %v614_v18 = vpop.f32.mrb[10].mxu1 }
 0xc34   :  { %v622_v20 = vadd.f32 %v618_v13, %v1462_v16  ;;  %v623_v21 = vadd.f32 %v619_v14, %v1464_v17  ;;  %v1197_v22 = vpop.f32.mrb[11].mxu1 }
 0xc36   :  { %v624_v23 = vmul.f32 %v622_v20, %v1467_v19  ;;  %v625_v24 = vmul.f32 %v623_v21, %v1467_v19 }
 0xc38   :  { %1282 = vtanh.f32 %v624_v23 }
 0xc39   :  { %1284 = vtanh.f32 %v625_v24 }
 0xc42   :  { %v1283_v25 = vpop.eup %1282 }
 0xc43   :  { %v1285_v26 = vpop.eup %1284  ;;  %v628_v27 = vmul.f32 %v1283_v25, %v1467_v19 }
 0xc44   :  { %v629_v28 = vmul.f32 %v1285_v26, %v1467_v19 }
 0xc45   :  { %v630_v29 = vadd.f32 %v628_v27, %v1476_v32 }
 0xc46   :  { %v631_v30 = vadd.f32 %v629_v28, %v1476_v32 }
 0xc47   :  { %642 = vrot.lane.b32.xlu0 %v630_v29, %s1369_s3  ;;  %v638_v38 = vmul.f32 %v634_v36, %v630_v29 }
 0xc48   :  { %644 = vrot.lane.b32.xlu1 %v631_v30, %s1369_s3  ;;  %v639_v39 = vmul.f32 %v635_v37, %v631_v30 }
 0xcb9   :  { %v643_v31 = vpop.permute.xlu0 %642 }
 0xcba   :  { %v645_v33 = vpop.permute.xlu1 %644  ;;  %v648_v34 = vmul.f32 %v643_v31, %v630_v29 }
 0xcbb   :  { %v649_v35 = vmul.f32 %v645_v33, %v631_v30 }
 0xcbc   :  { %652 = vrot.lane.b32.xlu0 %v648_v34, %s1369_s3 }
 0xcbd   :  { %654 = vrot.lane.b32.xlu1 %v649_v35, %s1369_s3 }
 0xd2e   :  { %v653_v40 = vpop.permute.xlu0 %652 }
 0xd2f   :  { %v655_v41 = vpop.permute.xlu1 %654  ;;  %v658_v42 = vadd.f32 %v653_v40, %v638_v38 }
 0xd30   :  { %v659_v43 = vadd.f32 %v655_v41, %v639_v39 }
 0xd31   :  { %1286 = vtanh.f32 %v658_v42  ;;  %v744_v18 = vrot.slane %v658_v42, 7 }
 0xd32   :  { %1288 = vtanh.f32 %v659_v43  ;;  %v745_v20 = vrot.slane %v659_v43, 7 }
 0xd3b   :  { %v1287_v44 = vpop.eup %1286 }
 0xd3c   :  { %v1289_v45 = vpop.eup %1288  ;;  %664 = vrot.lane.b32.xlu0 %v1287_v44, %s1369_s3 }
 0xd3d   :  { %666 = vrot.lane.b32.xlu1 %v1289_v45, %s1369_s3 }
 0xdae   :  { %v665_v46 = vpop.permute.xlu0 %664 }
 0xdaf   :  { %v667_v47 = vpop.permute.xlu1 %666  ;;  %v670_v48 = vmul.f32 %v665_v46, %v630_v29 }
 0xdb0   :  { %v671_v49 = vmul.f32 %v667_v47, %v631_v30 }
 0xdb1   :  { %v672_v50 = vpack.c.bf16 %v670_v48, %v670_v48 }
 0xdb2   :  { %v673_v51 = vpack.c.bf16 %v671_v49, %v671_v49 }
 0xdb3   :  { %v676_v52 = vunpack.c.l.b16 %v672_v50 }
 0xdb4   :  { %v677_v53 = vunpack.c.l.b16 %v673_v51 }
 0xdb5   :  { %v678_v54 = vrot.slane %v676_v52, 4 }
 0xdb6   :  { %v679_v55 = vrot.slane %v677_v53, 3 }
 0xdb8   :  { %v680_v56 = vsel %vm241_vm3, %v679_v55, %v678_v54 }
 0xdb9   :  { %v681_v57 = vpack.c.b16 %v680_v56, %v680_v56 }
 0xdbb   :  { %682 = vrot.lane.b32.xlu0 %v681_v57, %s1370_s20 }
 0xe2d   :  { %v683_v58 = vpop.permute.xlu0 %682 }
 0xe2e   :  { %1203 = vmatmul.mubr.msk.bf16.vlgmr.msra.gmra.mrb[12].mxu0 %vm142_vm4, %v683_v58 }
 0xe2f   :  { %1215 = vmatpush3.bf16.msra.mxu0 %v1432_v4  ;;  %1218 = vmatprep.mubr.msk.bf16.mxu0 %vm1366_vm0, %v1365_v0 }
 0xe30   :  { %1216 = vmatprep.subr.bf16.mxu0 %v1365_v0 }
 0xe33   :  { %1217 = vmatpush3.bf16.msra.mxu0 %v1441_v9 }
 0xf01   :  { %v721_v59 = vpop.f32.mrb[12].mxu0 }
 0xf02   :  { %v728_v60 = vrot.slane %v721_v59, 3  ;;  %v729_v61 = vrot.slane %v721_v59, 4  ;;  %v1204_v62 = vpop.f32.mrb[13].mxu0 }
 0xf03   :  { %v724_v63 = vpop.f32.mrb[14].mxu0 }
 0xf04   :  { %v732_v1 = vadd.f32 %v728_v60, %v1462_v16  ;;  %v733_v2 = vadd.f32 %v729_v61, %v1464_v17  ;;  %v1205_v3 = vpop.f32.mrb[15].mxu0 }
 0xf06   :  { %v734_v5 = vmul.f32 %v732_v1, %v1467_v19  ;;  %v735_v4 = vmul.f32 %v733_v2, %v1467_v19 }
 0xf08   :  { %1290 = vtanh.f32 %v734_v5 }
 0xf09   :  { %1292 = vtanh.f32 %v735_v4 }
 0xf12   :  { %v1291_v6 = vpop.eup %1290 }
 0xf13   :  { %v1293_v7 = vpop.eup %1292  ;;  %v738_v9 = vmul.f32 %v1291_v6, %v1467_v19 }
 0xf14   :  { %v739_v8 = vmul.f32 %v1293_v7, %v1467_v19 }
 0xf15   :  { %v740_v10 = vadd.f32 %v738_v9, %v1476_v32 }
 0xf16   :  { %v741_v11 = vadd.f32 %v739_v8, %v1476_v32 }
 0xf17   :  { %752 = vrot.lane.b32.xlu1 %v740_v10, %s1369_s3  ;;  %v748_v21 = vmul.f32 %v744_v18, %v740_v10 }
 0xf18   :  { %754 = vrot.lane.b32.xlu0 %v741_v11, %s1369_s3  ;;  %v749_v22 = vmul.f32 %v745_v20, %v741_v11 }
 0xf89   :  { %v753_v12 = vpop.permute.xlu1 %752 }
 0xf8a   :  { %v755_v13 = vpop.permute.xlu0 %754  ;;  %v758_v14 = vmul.f32 %v753_v12, %v740_v10 }
 0xf8b   :  { %v759_v15 = vmul.f32 %v755_v13, %v741_v11 }
 0xf8c   :  { %762 = vrot.lane.b32.xlu1 %v758_v14, %s1369_s3 }
 0xf8d   :  { %764 = vrot.lane.b32.xlu0 %v759_v15, %s1369_s3 }
 0xffe   :  { %v763_v23 = vpop.permute.xlu1 %762 }
 0xfff   :  { %v765_v24 = vpop.permute.xlu0 %764  ;;  %v768_v25 = vadd.f32 %v763_v23, %v748_v21 }
0x1000   :  { %v769_v26 = vadd.f32 %v765_v24, %v749_v22 }
0x1001   :  { %1294 = vtanh.f32 %v768_v25  ;;  %v854_v62 = vrot.slane %v768_v25, 7 }
0x1002   :  { %1296 = vtanh.f32 %v769_v26  ;;  %v855_v63 = vrot.slane %v769_v26, 7 }
0x100b   :  { %v1295_v27 = vpop.eup %1294 }
0x100c   :  { %v1297_v28 = vpop.eup %1296  ;;  %774 = vrot.lane.b32.xlu1 %v1295_v27, %s1369_s3 }
0x100d   :  { %776 = vrot.lane.b32.xlu0 %v1297_v28, %s1369_s3 }
0x107e   :  { %v775_v29 = vpop.permute.xlu1 %774 }
0x107f   :  { %v777_v30 = vpop.permute.xlu0 %776  ;;  %v780_v31 = vmul.f32 %v775_v29, %v740_v10 }
0x1080   :  { %v781_v33 = vmul.f32 %v777_v30, %v741_v11 }
0x1081   :  { %v782_v34 = vpack.c.bf16 %v780_v31, %v780_v31 }
0x1082   :  { %v783_v35 = vpack.c.bf16 %v781_v33, %v781_v33 }
0x1083   :  { %v786_v36 = vunpack.c.l.b16 %v782_v34 }
0x1084   :  { %v787_v37 = vunpack.c.l.b16 %v783_v35 }
0x1085   :  { %v788_v38 = vrot.slane %v786_v36, 5 }
0x1086   :  { %v789_v39 = vrot.slane %v787_v37, 4 }
0x1088   :  { %v790_v40 = vsel %vm241_vm3, %v789_v39, %v788_v38 }
0x1089   :  { %v791_v41 = vpack.c.b16 %v790_v40, %v790_v40 }
0x108b   :  { %792 = vrot.lane.b32.xlu1 %v791_v41, %s1370_s20 }
0x10fd   :  { %v793_v42 = vpop.permute.xlu1 %792 }
0x10fe   :  { %1211 = vmatmul.mubr.msk.bf16.vlgmr.msra.gmra.mrb[12].mxu1 %vm142_vm4, %v793_v42 }
0x10ff   :  { %1230 = vmatprep.mubr.msk.f32.mxu1 %vm1366_vm0, %v1365_v0 }
0x11d1   :  { %v831_v43 = vpop.f32.mrb[12].mxu1 }
0x11d2   :  { %v838_v44 = vrot.slane %v831_v43, 2  ;;  %v839_v45 = vrot.slane %v831_v43, 3  ;;  %v1212_v46 = vpop.f32.mrb[13].mxu1 }
0x11d3   :  { %v834_v47 = vpop.f32.mrb[14].mxu1 }
0x11d4   :  { %v842_v48 = vadd.f32 %v838_v44, %v1462_v16  ;;  %v843_v49 = vadd.f32 %v839_v45, %v1464_v17  ;;  %v1213_v50 = vpop.f32.mrb[15].mxu1 }
0x11d5   :  { %v1002_v50 = vld [vmem:[%s1670_s4] sm:$0xff] }
0x11d6   :  { %v844_v51 = vmul.f32 %v842_v48, %v1467_v19  ;;  %v845_v52 = vmul.f32 %v843_v49, %v1467_v19 }
0x11d8   :  { %1298 = vtanh.f32 %v844_v51  ;;  %v1003_v51 = vld [vmem:[%s1670_s4 + $0x8] sm:$0xff] }
0x11d9   :  { %1300 = vtanh.f32 %v845_v52  ;;  %v1004_v52 = vld [vmem:[%s1670_s4 + $0x10] sm:$0xff] }
0x11e2   :  { %v1299_v53 = vpop.eup %1298 }
0x11e3   :  { %v1301_v54 = vpop.eup %1300  ;;  %v848_v0 = vmul.f32 %v1299_v53, %v1467_v19  ;;  %v1371_v53 = vmov 0.0|0.0  }
0x11e4   :  { %v849_v55 = vmul.f32 %v1301_v54, %v1467_v19  ;;  %1233 = vmatprep.subr.bf16.mxu1 %v1371_v53  ;;  %v1234_v54 = vpack.c.bf16 %v1003_v51, %v1002_v50 }
0x11e5   :  { %v850_v56 = vadd.f32 %v848_v0, %v1476_v32  ;;  %v1005_v0 = vld [vmem:[%s1670_s4 + $0x18] sm:$0xff] }
0x11e6   :  { %v851_v57 = vadd.f32 %v849_v55, %v1476_v32  ;;  %1235 = vmatpush3.bf16.msra.mxu1 %v1234_v54  ;;  %v1237_v55 = vpack.c.bf16 %v1005_v0, %v1004_v52 }
0x11e7   :  { %862 = vrot.lane.b32.xlu0 %v850_v56, %s1369_s3  ;;  %v858_v1 = vmul.f32 %v854_v62, %v850_v56  ;;  %1236 = vmatprep.subr.bf16.mxu1 %v1371_v53 }
0x11e8   :  { %864 = vrot.lane.b32.xlu1 %v851_v57, %s1369_s3  ;;  %v859_v2 = vmul.f32 %v855_v63, %v851_v57 }
0x11ea   :  { %1238 = vmatpush3.bf16.msra.mxu1 %v1237_v55 }
0x1259   :  { %v863_v58 = vpop.permute.xlu0 %862 }
0x125a   :  { %v865_v59 = vpop.permute.xlu1 %864  ;;  %v868_v60 = vmul.f32 %v863_v58, %v850_v56 }
0x125b   :  { %v869_v61 = vmul.f32 %v865_v59, %v851_v57 }
0x125c   :  { %872 = vrot.lane.b32.xlu0 %v868_v60, %s1369_s3 }
0x125d   :  { %874 = vrot.lane.b32.xlu1 %v869_v61, %s1369_s3 }
0x12ce   :  { %v873_v3 = vpop.permute.xlu0 %872 }
0x12cf   :  { %v875_v5 = vpop.permute.xlu1 %874  ;;  %v878_v4 = vadd.f32 %v873_v3, %v858_v1  ;;  %v1119_v3 = vld [vmem:[%s1671_s5] ss:$0 sm:$0xff] }
0x12d0   :  { %v879_v6 = vadd.f32 %v875_v5, %v859_v2 }
0x12d1   :  { %1302 = vtanh.f32 %v878_v4  ;;  %v964_v44 = vrot.slane %v878_v4, 7 }
0x12d2   :  { %1304 = vtanh.f32 %v879_v6  ;;  %v965_v45 = vrot.slane %v879_v6, 7 }
0x12db   :  { %v1303_v7 = vpop.eup %1302 }
0x12dc   :  { %v1305_v9 = vpop.eup %1304  ;;  %884 = vrot.lane.b32.xlu0 %v1303_v7, %s1369_s3 }
0x12dd   :  { %886 = vrot.lane.b32.xlu1 %v1305_v9, %s1369_s3 }
0x134e   :  { %v885_v8 = vpop.permute.xlu0 %884 }
0x134f   :  { %v887_v10 = vpop.permute.xlu1 %886  ;;  %v890_v11 = vmul.f32 %v885_v8, %v850_v56 }
0x1350   :  { %v891_v12 = vmul.f32 %v887_v10, %v851_v57 }
0x1351   :  { %v892_v13 = vpack.c.bf16 %v890_v11, %v890_v11 }
0x1352   :  { %v893_v14 = vpack.c.bf16 %v891_v12, %v891_v12 }
0x1353   :  { %v896_v15 = vunpack.c.l.b16 %v892_v13 }
0x1354   :  { %v897_v18 = vunpack.c.l.b16 %v893_v14 }
0x1355   :  { %v898_v20 = vrot.slane %v896_v15, 6 }
0x1356   :  { %v899_v21 = vrot.slane %v897_v18, 5 }
0x1358   :  { %v900_v22 = vsel %vm241_vm3, %v899_v21, %v898_v20 }
0x1359   :  { %v901_v23 = vpack.c.b16 %v900_v22, %v900_v22 }
0x135b   :  { %902 = vrot.lane.b32.xlu0 %v901_v23, %s1370_s20 }
0x13cd   :  { %v903_v24 = vpop.permute.xlu0 %902 }
0x13ce   :  { %1219 = vmatmul.mubr.msk.bf16.vlgmr.msra.gmra.mrb[16].mxu0 %vm142_vm4, %v903_v24 }
0x14a1   :  { %v941_v25 = vpop.f32.mrb[16].mxu0 }
0x14a2   :  { %v948_v26 = vrot.slane %v941_v25, 1  ;;  %v949_v27 = vrot.slane %v941_v25, 2  ;;  %v1220_v28 = vpop.f32.mrb[17].mxu0 }
0x14a3   :  { %v944_v29 = vpop.f32.mrb[18].mxu0 }
0x14a4   :  { %v952_v30 = vadd.f32 %v948_v26, %v1462_v16  ;;  %v953_v31 = vadd.f32 %v949_v27, %v1464_v17  ;;  %v1221_v33 = vpop.f32.mrb[19].mxu0 }
0x14a6   :  { %v954_v34 = vmul.f32 %v952_v30, %v1467_v19  ;;  %v955_v35 = vmul.f32 %v953_v31, %v1467_v19 }
0x14a8   :  { %1306 = vtanh.f32 %v954_v34 }
0x14a9   :  { %1308 = vtanh.f32 %v955_v35 }
0x14b2   :  { %v1307_v36 = vpop.eup %1306 }
0x14b3   :  { %v1309_v37 = vpop.eup %1308  ;;  %v958_v38 = vmul.f32 %v1307_v36, %v1467_v19 }
0x14b4   :  { %v959_v39 = vmul.f32 %v1309_v37, %v1467_v19 }
0x14b5   :  { %v960_v40 = vadd.f32 %v958_v38, %v1476_v32 }
0x14b6   :  { %v961_v41 = vadd.f32 %v959_v39, %v1476_v32 }
0x14b7   :  { %972 = vrot.lane.b32.xlu1 %v960_v40, %s1369_s3  ;;  %v968_v46 = vmul.f32 %v964_v44, %v960_v40 }
0x14b8   :  { %974 = vrot.lane.b32.xlu0 %v961_v41, %s1369_s3  ;;  %v969_v19 = vmul.f32 %v965_v45, %v961_v41 }
0x1529   :  { %v973_v16 = vpop.permute.xlu1 %972 }
0x152a   :  { %v975_v17 = vpop.permute.xlu0 %974  ;;  %v978_v42 = vmul.f32 %v973_v16, %v960_v40 }
0x152b   :  { %v979_v43 = vmul.f32 %v975_v17, %v961_v41 }
0x152c   :  { %982 = vrot.lane.b32.xlu1 %v978_v42, %s1369_s3 }
0x152d   :  { %984 = vrot.lane.b32.xlu0 %v979_v43, %s1369_s3 }
0x159e   :  { %v983_v47 = vpop.permute.xlu1 %982 }
0x159f   :  { %v985_v48 = vpop.permute.xlu0 %984  ;;  %v988_v49 = vadd.f32 %v983_v47, %v968_v46 }
0x15a0   :  { %v989_v32 = vadd.f32 %v985_v48, %v969_v19 }
0x15a1   :  { %1310 = vtanh.f32 %v988_v49 }
0x15a2   :  { %1312 = vtanh.f32 %v989_v32 }
0x15ab   :  { %v1311_v56 = vpop.eup %1310 }
0x15ac   :  { %v1313_v57 = vpop.eup %1312  ;;  %994 = vrot.lane.b32.xlu1 %v1311_v56, %s1369_s3 }
0x15ad   :  { %996 = vrot.lane.b32.xlu0 %v1313_v57, %s1369_s3 }
0x161e   :  { %v995_v58 = vpop.permute.xlu1 %994 }
0x161f   :  { %v997_v59 = vpop.permute.xlu0 %996  ;;  %v1000_v60 = vmul.f32 %v995_v58, %v960_v40 }
0x1620   :  { %v1001_v61 = vmul.f32 %v997_v59, %v961_v41 }
0x1621   :  { %v1015_v62 = vrot.slane %v1000_v60, 7 }
0x1622   :  { %v1016_v63 = vrot.slane %v1001_v61, 6 }
0x1624   :  { %v1017_v1 = vsel %vm241_vm3, %v1016_v63, %v1015_v62 }
0x1625   :  { %1018 = vrot.lane.b32.xlu1 %v1017_v1, %s1370_s20 }
0x1697   :  { %v1019_v2 = vpop.permute.xlu1 %1018 }
0x1698   :  { %1231 = vmatmul.mubr.msk.f32.vlgmr.msra.gmra.mrb[16].mxu1 %vm142_vm4, %v1019_v2 }
0x176b   :  { %v1088_v5 = vpop.f32.mrb[16].mxu1 }
0x176c   :  { %v1089_v4 = vadd.f32 %v1119_v3, %v1088_v5  ;;  %v1232_v6 = vpop.f32.mrb[17].mxu1 }
0x176e   :  { %1093 = vst.msk [vmem:[#allocation5] sm:$0x3] %vm1092_vm5, %v1089_v4 }
0x176f   :  { %1347 = shalt.err (!%p1344_p12)
}
0x1770   :  { %s1348_s11 = scalar_lea.hbm %s1672_s6, 32 }
0x1771   :  { %p1349_p13 = scmp.ne.s32.totalorder %s1672_s6, %s1348_s11  ;;  %p1352_p0 = scmp.lt.u32.totalorder %s1348_s11, %s1672_s6 }
0x1773   :  { %p1354_p1 = pnand %p1352_p0, %p1349_p13 }
0x1775   :  { %1357 = shalt.err (!%p1354_p1)
}
0x1776   :  { %1103 = dma.vmem_to_hbm [thread:$0]  %s1101_s7, 32, %s1672_s6, [#allocation4]  }
0x1777   :  { %1360 = dma.done.wait [#allocation4], 32  }
0x1778   :  { %1361 = vsyncadd [#allocation4], 4294967264 }
0x1779   :  { %1107 = vsyncpa [#allocation3], 1 }
0x177a   :  { %1108 = vsyncpa [#allocation4], 1 }

</bundles_post_ra>
